<compile_context>
chip_gen: v6e
topology: v6e:2x2x1
jax: 0.10.0
libtpu: 0.0.40
codegen_flags: <defaults>
</compile_context>

<pallas_src>
import jax
import jax.numpy as jnp
from jax.experimental import pallas as pl
from jax.experimental.pallas import tpu as pltpu


def _round_up(x: int, m: int) -> int:
    return ((x + m - 1) // m) * m


def _largest_aligned_divisor(total: int, cap: int, unit: int) -> int:
    """Largest multiple of `unit` that divides `total` and is <= cap (>= unit)."""
    cap = max(unit, min(cap, total))
    best = unit
    d = unit
    while d <= cap:
        if total % d == 0:
            best = d
        d += unit
    return best


def _fused_mlp_kernel(x_ref, w1_ref, w2_ref, o_ref, acc_ref):
    """One (M-tile, K-tile) step of  out = relu(x @ W1) @ W2.

    acc_ref: VMEM f32 [tm, R] accumulator for the backbone features, persistent
    across the K grid axis.  ReLU + head matmul + store only on the last K step,
    so the feature never touches HBM.  x is cast to the weight dtype per tile
    inside the kernel (no wrapper-side cast/pad round trip).
    """
    k = pl.program_id(1)

    @pl.when(k == 0)
    def _():
        acc_ref[...] = jnp.zeros_like(acc_ref)

    x_tile = x_ref[...].astype(w1_ref.dtype)  # in-kernel f32 -> bf16 cast (VPU)
    acc_ref[...] += jnp.dot(
        x_tile, w1_ref[...], preferred_element_type=jnp.float32
    )

    @pl.when(k == pl.num_programs(1) - 1)
    def _():
        feat = jnp.maximum(acc_ref[...], 0.0).astype(w2_ref.dtype)
        o_ref[...] = jnp.dot(
            feat, w2_ref[...], preferred_element_type=jnp.float32
        ).astype(o_ref.dtype)


def _select_tiles(M, K, R, N_p, x_itemsize, w_itemsize, out_itemsize,
                  tm_cap=256, tk_cap=2048, vmem_budget=24 * 1024 * 1024):
    """Pick (tm, tk, M_p, K_p) from a VMEM-footprint budget (not fixed 128/512)."""
    K_p = _round_up(K, 128)
    tk = _largest_aligned_divisor(K_p, tk_cap, 128)   # full K when it fits

    if M <= tm_cap:
        tm = _round_up(M, 8)          # single row block; no pad if M % 8 == 0
        M_p = tm
    elif M % 8 == 0:
        tm = _largest_aligned_divisor(M, tm_cap, 8)
        if tm < 64:                   # poor divisor -> pad instead
            tm = tm_cap
            M_p = _round_up(M, tm)
        else:
            M_p = M
    else:
        tm = tm_cap
        M_p = _round_up(M, tm)

    def footprint(tm_, tk_):
        return (2 * tm_ * tk_ * x_itemsize        # double-buffered x tiles
                + 2 * tk_ * R * w_itemsize        # double-buffered W1 tiles
                + 2 * R * N_p * w_itemsize        # W2 (small, VMEM-resident)
                + tm_ * R * 4                     # f32 feature accumulator
                + 2 * tm_ * N_p * out_itemsize)   # double-buffered out tiles

    while footprint(tm, tk) > vmem_budget and tk > 128:
        tk = _largest_aligned_divisor(K_p, tk // 2, 128)

    return tm, tk, M_p, K_p, footprint(tm, tk)


def prepare_network_weights(w_backbone, w_final, compute_dtype=jnp.bfloat16):
    """Cast + pad weights ONCE (call at init, not on the hot path).

    w_backbone: [K, R] -> bf16 [K_p, R]   (only K padded to a 128 multiple)
    w_final   : [R, N] -> bf16 [R, N_p]   (only N padded so stores are lane-dense)
    """
    K, R = w_backbone.shape
    R2, N = w_final.shape
    assert R == R2
    K_p = _round_up(K, 128)
    N_p = _round_up(N, 128)
    w1_p = jnp.zeros((K_p, R), compute_dtype).at[:K, :].set(
        w_backbone.astype(compute_dtype))
    w2_p = jnp.zeros((R, N_p), compute_dtype).at[:, :N].set(
        w_final.astype(compute_dtype))
    return w1_p, w2_p


def network_forward_pallas(x_flat, w1_p, w2_p, n_out, *, out_dtype=jnp.float32):
    """Fused  relu(x_flat @ W1) @ W2  in a single Pallas TPU kernel.

    x_flat: [M, K] (any float dtype; cast per-tile in-kernel)
    w1_p  : [K_p, R]  pre-cast/padded (from prepare_network_weights)
    w2_p  : [R, N_p]  pre-cast/padded
    returns [M, n_out] in out_dtype.
    """
    M, K = x_flat.shape
    K_p, R = w1_p.shape
    R2, N_p = w2_p.shape
    assert R == R2 and K_p >= K and K_p % 128 == 0 and N_p % 128 == 0

    x_itemsize = jnp.dtype(x_flat.dtype).itemsize
    w_itemsize = jnp.dtype(w1_p.dtype).itemsize
    out_itemsize = jnp.dtype(out_dtype).itemsize

    tm, tk, M_p, K_p2, fp = _select_tiles(
        M, K, R, N_p, x_itemsize, w_itemsize, out_itemsize)
    assert K_p2 == K_p

    # Pad activations only when the natural shape is not already tile-aligned
    # (the aligned common case streams x straight from HBM, cast in-kernel).
    if (M_p, K_p) != (M, K):
        x_in = jnp.zeros((M_p, K_p), x_flat.dtype).at[:M, :K].set(x_flat)
    else:
        x_in = x_flat

    grid = (M_p // tm, K_p // tk)
    m_tiles, _ = grid
    # NOTE: for tiny batches (e.g. B=2) the M axis has a single block, so on
    # v7x the second TensorCore idles; with realistic batches (>= 2*tm rows)
    # the "parallel" M axis shards across both cores automatically.

    flops = 2 * M_p * K_p * R + 2 * M_p * R * N_p
    bytes_accessed = (M_p * K_p * x_itemsize            # x streamed once
                      + m_tiles * K_p * R * w_itemsize  # W1 re-streamed per M tile
                      + R * N_p * w_itemsize            # W2 (tiny)
                      + M_p * N_p * out_itemsize)       # output writeback

    out_p = pl.pallas_call(
        _fused_mlp_kernel,
        out_shape=jax.ShapeDtypeStruct((M_p, N_p), out_dtype),
        grid_spec=pltpu.PrefetchScalarGridSpec(
            num_scalar_prefetch=0,
            grid=grid,
            in_specs=[
                # x tile: row block i, K-chunk k (native dtype, cast in kernel)
                pl.BlockSpec((tm, tk), lambda i, k: (i, k)),
                # W1 tile: K-chunk k, full (unpadded) rep_dim
                pl.BlockSpec((tk, R), lambda i, k: (k, 0)),
                # W2: small, fully VMEM-resident, block index never changes
                pl.BlockSpec((R, N_p), lambda i, k: (0, 0)),
            ],
            # Output block depends only on i -> resident across the K axis,
            # written once on the last K step.  Lane-dense (N_p % 128 == 0).
            out_specs=pl.BlockSpec((tm, N_p), lambda i, k: (i, 0)),
            scratch_shapes=[pltpu.VMEM((tm, R), jnp.float32)],
        ),
        compiler_params=pltpu.CompilerParams(
            dimension_semantics=("parallel", "arbitrary"),
            vmem_limit_bytes=int(min(max(2 * fp + (4 << 20), 16 << 20), 64 << 20)),
        ),
        cost_estimate=pl.CostEstimate(
            flops=flops, transcendentals=0, bytes_accessed=bytes_accessed
        ),
    )(x_in, w1_p, w2_p)

    return out_p[:M, :n_out]


class NetworkPallas:
    """JAX/Pallas equivalent of the PyTorch `Network` module.

    Synthetic backbone (flatten -> Linear -> ReLU) stands in for the injected
    `backbone`; the bias-free head matches nn.Linear(rep_dim, class_num,
    bias=False).  Weights are stored as [in, out] so the kernel computes
    x @ W (== x @ W_torch.T).  Padded bf16 copies are built once at init.
    """

    def __init__(self, in_shape, rep_dim, class_num, key):
        C, H, W = in_shape
        in_features = C * H * W
        k1, k2 = jax.random.split(key)
        # Deterministic synthetic parameters (stand-in for checkpoint weights).
        self.w_backbone = (
            jax.random.normal(k1, (in_features, rep_dim), jnp.float32) * 0.02
        )
        self.w_final = (
            jax.random.normal(k2, (rep_dim, class_num), jnp.float32) * 0.02
        )
        # Cast + pad ONCE (removed from the per-call hot path).
        self.w1_p, self.w2_p = prepare_network_weights(self.w_backbone, self.w_final)
        self.in_shape = in_shape
        self.rep_dim = rep_dim
        self.class_num = class_num

    def __call__(self, x):
        B = x.shape[0]
        # Glue: flatten NCHW in torch order; both matmuls + ReLU run fused in
        # a single Pallas kernel (the feature stays in VMEM).
        x_flat = x.reshape(B, -1)
        return network_forward_pallas(x_flat, self.w1_p, self.w2_p, self.class_num)


def _reference_forward(x, w1, w2, compute_dtype=jnp.bfloat16):
    """Pure-JAX reference matching the kernel's bf16-input / f32-accum math."""
    hi = jax.lax.Precision.HIGHEST
    xf = x.reshape(x.shape[0], -1).astype(compute_dtype).astype(jnp.float32)
    w1f = w1.astype(compute_dtype).astype(jnp.float32)
    w2f = w2.astype(compute_dtype).astype(jnp.float32)
    feat = jnp.maximum(jnp.dot(xf, w1f, precision=hi), 0.0)
    feat = feat.astype(compute_dtype).astype(jnp.float32)
    return jnp.dot(feat, w2f, precision=hi)


if __name__ == "__main__":
    key = jax.random.PRNGKey(0)
    k_x, k_p = jax.random.split(key)

    B, C, H, W = 2, 4, 16, 16
    rep_dim, class_num = 32, 8

    x = jax.random.normal(k_x, (B, C, H, W), jnp.float32)

    net = NetworkPallas((C, H, W), rep_dim, class_num, k_p)
    out = jax.block_until_ready(net(x))

    out_ref = _reference_forward(x, net.w_backbone, net.w_final)

    assert out.shape == (B, class_num)
    max_err = float(jnp.max(jnp.abs(out - out_ref)))
    assert jnp.allclose(out, out_ref, atol=1e-3, rtol=1e-3), max_err

    print("KERNEL_OK")
</pallas_src>

<mosaic_0001>
module attributes {stable_mosaic.version = 11 : i64} {
  func.func @_fused_mlp_kernel(%arg0: i32, %arg1: i32, %arg2: memref<8x1024xf32, #tpu.memory_space<vmem>>, %arg3: memref<1024x32xbf16, #tpu.memory_space<vmem>>, %arg4: memref<32x128xbf16, #tpu.memory_space<vmem>>, %arg5: memref<8x128xf32, #tpu.memory_space<vmem>>, %arg6: memref<8x32xf32, #tpu.memory_space<vmem>>) attributes {dimension_semantics = [#tpu.dimension_semantics<parallel>, #tpu.dimension_semantics<arbitrary>], iteration_bounds = array<i64: 1, 1>, scalar_prefetch = 0 : i64, scratch_operands = 1 : i64, tpu.core_type = #tpu.core_type<tc>, window_params = [{transform_indices = @transform_0, window_bounds = array<i64: 8, 1024>}, {transform_indices = @transform_1, window_bounds = array<i64: 1024, 32>}, {pipeline_mode = #tpu.pipeline_mode<synchronous>, transform_indices = @transform_2, window_bounds = array<i64: 32, 128>}, {transform_indices = @transform_3, window_bounds = array<i64: 8, 128>}]} {
    %c0_i32 = arith.constant 0 : i32
    %0 = arith.cmpi eq, %arg1, %c0_i32 : i32
    %1 = arith.extui %0 : i1 to i32
    %c0_i32_0 = arith.constant 0 : i32
    %2 = arith.cmpi ne, %1, %c0_i32_0 : i32
    scf.if %2 {
      %cst_10 = arith.constant 0.000000e+00 : f32
      %13 = vector.broadcast %cst_10 : f32 to vector<8x32xf32>
      %c0_11 = arith.constant 0 : index
      %c0_12 = arith.constant 0 : index
      %14 = vector.load %arg6[%c0_11, %c0_12] : memref<8x32xf32, #tpu.memory_space<vmem>>, vector<8x32xf32>
      tpu.vector_store %arg6[%c0_11, %c0_12], %13 {strides = array<i32>} : memref<8x32xf32, #tpu.memory_space<vmem>>, vector<8x32xf32>,
    } else {
    }
    %c0 = arith.constant 0 : index
    %c0_1 = arith.constant 0 : index
    %3 = vector.load %arg2[%c0, %c0_1] : memref<8x1024xf32, #tpu.memory_space<vmem>>, vector<8x1024xf32>
    %4 = arith.truncf %3 : vector<8x1024xf32> to vector<8x1024xbf16>
    %c0_2 = arith.constant 0 : index
    %c0_3 = arith.constant 0 : index
    %5 = vector.load %arg6[%c0_2, %c0_3] : memref<8x32xf32, #tpu.memory_space<vmem>>, vector<8x32xf32>
    %c0_4 = arith.constant 0 : index
    %c0_5 = arith.constant 0 : index
    %6 = vector.load %arg3[%c0_4, %c0_5] : memref<1024x32xbf16, #tpu.memory_space<vmem>>, vector<1024x32xbf16>
    %cst = arith.constant dense<0.000000e+00> : vector<8x32xf32>
    %7 = tpu.matmul %4, %6, %cst {dimension_numbers = #tpu.dot_dimension_numbers<[1], [0], [0], [1], [0, 0, 1, 1], [], []>} : vector<8x1024xbf16>, vector<1024x32xbf16>, vector<8x32xf32> -> vector<8x32xf32>
    %8 = arith.addf %5, %7 : vector<8x32xf32>
    %c0_6 = arith.constant 0 : index
    %c0_7 = arith.constant 0 : index
    %9 = vector.load %arg6[%c0_6, %c0_7] : memref<8x32xf32, #tpu.memory_space<vmem>>, vector<8x32xf32>
    tpu.vector_store %arg6[%c0_6, %c0_7], %8 {strides = array<i32>} : memref<8x32xf32, #tpu.memory_space<vmem>>, vector<8x32xf32>,
    %c0_i32_8 = arith.constant 0 : i32
    %10 = arith.cmpi eq, %arg1, %c0_i32_8 : i32
    %11 = arith.extui %10 : i1 to i32
    %c0_i32_9 = arith.constant 0 : i32
    %12 = arith.cmpi ne, %11, %c0_i32_9 : i32
    scf.if %12 {
      %c0_10 = arith.constant 0 : index
      %c0_11 = arith.constant 0 : index
      %13 = vector.load %arg6[%c0_10, %c0_11] : memref<8x32xf32, #tpu.memory_space<vmem>>, vector<8x32xf32>
      %cst_12 = arith.constant 0.000000e+00 : f32
      %14 = vector.broadcast %cst_12 : f32 to vector<8x32xf32>
      %15 = arith.maximumf %13, %14 : vector<8x32xf32>
      %16 = arith.truncf %15 : vector<8x32xf32> to vector<8x32xbf16>
      %c0_13 = arith.constant 0 : index
      %c0_14 = arith.constant 0 : index
      %17 = vector.load %arg4[%c0_13, %c0_14] : memref<32x128xbf16, #tpu.memory_space<vmem>>, vector<32x128xbf16>
      %cst_15 = arith.constant dense<0.000000e+00> : vector<8x128xf32>
      %18 = tpu.matmul %16, %17, %cst_15 {dimension_numbers = #tpu.dot_dimension_numbers<[1], [0], [0], [1], [0, 0, 1, 1], [], []>} : vector<8x32xbf16>, vector<32x128xbf16>, vector<8x128xf32> -> vector<8x128xf32>
      %c0_16 = arith.constant 0 : index
      %c0_17 = arith.constant 0 : index
      %19 = vector.load %arg5[%c0_16, %c0_17] : memref<8x128xf32, #tpu.memory_space<vmem>>, vector<8x128xf32>
      tpu.vector_store %arg5[%c0_16, %c0_17], %18 {strides = array<i32>} : memref<8x128xf32, #tpu.memory_space<vmem>>, vector<8x128xf32>,
    } else {
    }
    return
  }
  func.func @transform_0(%arg0: i32, %arg1: i32) -> (i32, i32) {
    %c0_i32 = arith.constant 0 : i32
    return %arg0, %arg1 : i32, i32
  }
  func.func @transform_1(%arg0: i32, %arg1: i32) -> (i32, i32) {
    %c0_i32 = arith.constant 0 : i32
    %c0_i32_0 = arith.constant 0 : i32
    return %arg1, %c0_i32 : i32, i32
  }
  func.func @transform_2(%arg0: i32, %arg1: i32) -> (i32, i32) {
    %c0_i32 = arith.constant 0 : i32
    %c0_i32_0 = arith.constant 0 : i32
    %c0_i32_1 = arith.constant 0 : i32
    return %c0_i32, %c0_i32_0 : i32, i32
  }
  func.func @transform_3(%arg0: i32, %arg1: i32) -> (i32, i32) {
    %c0_i32 = arith.constant 0 : i32
    %c0_i32_0 = arith.constant 0 : i32
    return %arg0, %c0_i32 : i32, i32
  }
}

</mosaic_0001>

<bundles_post_ra>
// kernel: tpu_custom_call.1
= control target key start
LH: loop header
LB: loop body
LE: loop exit
PB: predicated region body
PF: predicated region fallthrough
CT: control target
= control target key end

     0   :  { %s1302_s0 = inlined_call_operand.vmem [shape: f32[8,1024], index: 0, kind: input, shape index: {}]   ;;  %s1303_s1 = inlined_call_operand.vmem [shape: bf16[1024,32], index: 1, kind: input, shape index: {}]   ;;  %s1304_s2 = inlined_call_operand.vmem [shape: bf16[32,128], index: 2, kind: input, shape index: {}]   ;;  %s1305_s3 = inlined_call_operand.hbm [shape: f32[8,128], index: 3, kind: output, shape index: {}]  }
   0x1   :  { %v963_v0 = vld [vmem:[%s1303_s1 + $0x78] sm:$0xff]   ;;  %v967_v4 = vld [vmem:[%s1303_s1 + $0x70] sm:$0xff]   ;;  %v971_v8 = vld [vmem:[%s1303_s1 + $0x68] sm:$0xff]  }
   0x2   :  { %v964_v1 = vld [vmem:[%s1303_s1 + $0xf8] sm:$0xff]   ;;  %861 = vmatprep.subr.bf16.mxu0 %v963_v0  ;;  %v968_v5 = vld [vmem:[%s1303_s1 + $0xf0] sm:$0xff]   ;;  %v972_v9 = vld [vmem:[%s1303_s1 + $0xe8] sm:$0xff]  }
   0x3   :  { %v965_v2 = vld [vmem:[%s1303_s1 + $0x38] sm:$0xff]   ;;  %883 = vmatprep.subr.bf16.mxu1 %v964_v1  ;;  %v969_v6 = vld [vmem:[%s1303_s1 + $0x30] sm:$0xff]   ;;  %v973_v10 = vld [vmem:[%s1303_s1 + $0x28] sm:$0xff]  }
   0x4   :  { %v966_v3 = vld [vmem:[%s1303_s1 + $0xb8] sm:$0xff]   ;;  %862 = vmatpush3.bf16.msra.mxu0 %v965_v2  ;;  %v970_v7 = vld [vmem:[%s1303_s1 + $0xb0] sm:$0xff]   ;;  %v974_v11 = vld [vmem:[%s1303_s1 + $0xa8] sm:$0xff]  }
   0x5   :  { %884 = vmatpush3.bf16.msra.mxu1 %v966_v3  ;;  %863 = vmatprep.subr.bf16.mxu0 %v967_v4  ;;  %v975_v12 = vld [vmem:[%s1303_s1 + $0x60] sm:$0xff]   ;;  %v979_v16 = vld [vmem:[%s1303_s1 + $0x58] sm:$0xff]   ;;  %v983_v20 = vld [vmem:[%s1303_s1 + $0x50] sm:$0xff]  }
   0x6   :  { %885 = vmatprep.subr.bf16.mxu1 %v968_v5  ;;  %v976_v13 = vld [vmem:[%s1303_s1 + $0xe0] sm:$0xff]   ;;  %v980_v17 = vld [vmem:[%s1303_s1 + $0xd8] sm:$0xff]   ;;  %v984_v21 = vld [vmem:[%s1303_s1 + $0xd0] sm:$0xff]  }
   0x7   :  { %v977_v14 = vld [vmem:[%s1303_s1 + $0x20] sm:$0xff]   ;;  %v981_v18 = vld [vmem:[%s1303_s1 + $0x18] sm:$0xff]   ;;  %v985_v22 = vld [vmem:[%s1303_s1 + $0x10] sm:$0xff]  }
   0x8   :  { %864 = vmatpush3.bf16.msra.mxu0 %v969_v6  ;;  %v978_v15 = vld [vmem:[%s1303_s1 + $0xa0] sm:$0xff]   ;;  %v982_v19 = vld [vmem:[%s1303_s1 + $0x98] sm:$0xff]   ;;  %v986_v23 = vld [vmem:[%s1303_s1 + $0x90] sm:$0xff]  }
   0x9   :  { %886 = vmatpush3.bf16.msra.mxu1 %v970_v7  ;;  %865 = vmatprep.subr.bf16.mxu0 %v971_v8  ;;  %v987_v24 = vld [vmem:[%s1303_s1 + $0x48] sm:$0xff]   ;;  %v991_v28 = vld [vmem:[%s1303_s1 + $0x40] sm:$0xff]   ;;  %v25_v33 = vld [vmem:[%s1302_s0 + $0x18] sm:$0xff] }
   0xa   :  { %887 = vmatprep.subr.bf16.mxu1 %v972_v9  ;;  %v988_v25 = vld [vmem:[%s1303_s1 + $0xc8] sm:$0xff]   ;;  %v992_v29 = vld [vmem:[%s1303_s1 + $0xc0] sm:$0xff]   ;;  %v33_v36 = vpack.c.bf16 %v25_v33, %v25_v33  ;;  %v24_v38 = vld [vmem:[%s1302_s0 + $0x10] sm:$0xff] }
   0xb   :  { %v989_v26 = vld [vmem:[%s1303_s1 + $0x8] sm:$0xff]   ;;  %v993_v30 = vld [vmem:[%s1303_s1] sm:$0xff]   ;;  %v32_v39 = vpack.c.bf16 %v24_v38, %v24_v38  ;;  %v995_v40 = vld [vmem:[%s1303_s1 + $0x178] sm:$0xff]  }
   0xc   :  { %866 = vmatpush3.bf16.msra.mxu0 %v973_v10  ;;  %v990_v27 = vld [vmem:[%s1303_s1 + $0x88] sm:$0xff]   ;;  %v994_v31 = vld [vmem:[%s1303_s1 + $0x80] sm:$0xff]   ;;  %623 = vmatprep.mubr.bf16.mxu1 %v33_v36  ;;  %v996_v41 = vld [vmem:[%s1303_s1 + $0x1f8] sm:$0xff]  }
   0xd   :  { %888 = vmatpush3.bf16.msra.mxu1 %v974_v11  ;;  %867 = vmatprep.subr.bf16.mxu0 %v975_v12  ;;  %v23_v32 = vld [vmem:[%s1302_s0 + $0x8] sm:$0xff]  ;;  %v22_v34 = vld [vmem:[%s1302_s0] sm:$0xff]  ;;  %v997_v42 = vld [vmem:[%s1303_s1 + $0x138] sm:$0xff]  }
   0xe   :  { %889 = vmatprep.subr.bf16.mxu1 %v976_v13  ;;  %v31_v35 = vpack.c.bf16 %v23_v32, %v23_v32  ;;  %v30_v37 = vpack.c.bf16 %v22_v34, %v22_v34  ;;  %v998_v43 = vld [vmem:[%s1303_s1 + $0x1b8] sm:$0xff]   ;;  %v999_v44 = vld [vmem:[%s1303_s1 + $0x170] sm:$0xff]   ;;  %v1003_v48 = vld [vmem:[%s1303_s1 + $0x168] sm:$0xff]  }
   0xf   :  { %v1000_v45 = vld [vmem:[%s1303_s1 + $0x1f0] sm:$0xff]   ;;  %v1004_v49 = vld [vmem:[%s1303_s1 + $0x1e8] sm:$0xff]   ;;  %v1007_v52 = vld [vmem:[%s1303_s1 + $0x160] sm:$0xff]  }
  0x10   :  { %868 = vmatpush3.bf16.msra.mxu0 %v977_v14  ;;  %583 = vmatprep.mubr.bf16.mxu0 %v31_v35  ;;  %v1001_v46 = vld [vmem:[%s1303_s1 + $0x130] sm:$0xff]   ;;  %v1005_v50 = vld [vmem:[%s1303_s1 + $0x128] sm:$0xff]   ;;  %v1008_v53 = vld [vmem:[%s1303_s1 + $0x1e0] sm:$0xff]  }
  0x11   :  { %890 = vmatpush3.bf16.msra.mxu1 %v978_v15  ;;  %869 = vmatprep.subr.bf16.mxu0 %v979_v16  ;;  %v1002_v47 = vld [vmem:[%s1303_s1 + $0x1b0] sm:$0xff]   ;;  %v1006_v51 = vld [vmem:[%s1303_s1 + $0x1a8] sm:$0xff]   ;;  %v1009_v54 = vld [vmem:[%s1303_s1 + $0x120] sm:$0xff]  }
  0x12   :  { %891 = vmatprep.subr.bf16.mxu1 %v980_v17  ;;  %v1010_v55 = vld [vmem:[%s1303_s1 + $0x1a0] sm:$0xff]   ;;  %v1011_v56 = vld [vmem:[%s1303_s1 + $0x158] sm:$0xff]   ;;  %v1015_v60 = vld [vmem:[%s1303_s1 + $0x150] sm:$0xff]  }
  0x13   :  { %v1012_v57 = vld [vmem:[%s1303_s1 + $0x1d8] sm:$0xff]   ;;  %v1016_v61 = vld [vmem:[%s1303_s1 + $0x1d0] sm:$0xff]   ;;  %v1019_v0 = vld [vmem:[%s1303_s1 + $0x148] sm:$0xff]  }
  0x14   :  { %870 = vmatpush3.bf16.msra.mxu0 %v981_v18  ;;  %v1013_v58 = vld [vmem:[%s1303_s1 + $0x118] sm:$0xff]   ;;  %v1017_v62 = vld [vmem:[%s1303_s1 + $0x110] sm:$0xff]   ;;  %v1020_v1 = vld [vmem:[%s1303_s1 + $0x1c8] sm:$0xff]  }
  0x15   :  { %892 = vmatpush3.bf16.msra.mxu1 %v982_v19  ;;  %871 = vmatprep.subr.bf16.mxu0 %v983_v20  ;;  %v1014_v59 = vld [vmem:[%s1303_s1 + $0x198] sm:$0xff]   ;;  %v1018_v63 = vld [vmem:[%s1303_s1 + $0x190] sm:$0xff]   ;;  %v1021_v2 = vld [vmem:[%s1303_s1 + $0x108] sm:$0xff]  }
  0x16   :  { %893 = vmatprep.subr.bf16.mxu1 %v984_v21  ;;  %v1022_v3 = vld [vmem:[%s1303_s1 + $0x188] sm:$0xff]   ;;  %v1023_v4 = vld [vmem:[%s1303_s1 + $0x140] sm:$0xff]   ;;  %v29_v9 = vld [vmem:[%s1302_s0 + $0x38] sm:$0xff] }
  0x17   :  { %v1024_v5 = vld [vmem:[%s1303_s1 + $0x1c0] sm:$0xff]   ;;  %v27_v8 = vld [vmem:[%s1302_s0 + $0x28] sm:$0xff]  ;;  %v37_v11 = vpack.c.bf16 %v29_v9, %v29_v9  ;;  %v28_v13 = vld [vmem:[%s1302_s0 + $0x30] sm:$0xff] }
  0x18   :  { %872 = vmatpush3.bf16.msra.mxu0 %v985_v22  ;;  %v1025_v6 = vld [vmem:[%s1303_s1 + $0x100] sm:$0xff]   ;;  %v35_v10 = vpack.c.bf16 %v27_v8, %v27_v8  ;;  %v36_v15 = vpack.c.bf16 %v28_v13, %v28_v13 }
  0x19   :  { %894 = vmatpush3.bf16.msra.mxu1 %v986_v23  ;;  %873 = vmatprep.subr.bf16.mxu0 %v987_v24  ;;  %v1026_v7 = vld [vmem:[%s1303_s1 + $0x180] sm:$0xff]  }
  0x1a   :  { %895 = vmatprep.subr.bf16.mxu1 %v988_v25  ;;  %v26_v12 = vld [vmem:[%s1302_s0 + $0x20] sm:$0xff] }
  0x1b   :  { %v34_v14 = vpack.c.bf16 %v26_v12, %v26_v12 }
  0x1c   :  { %874 = vmatpush3.bf16.msra.mxu0 %v989_v26 }
  0x1d   :  { %896 = vmatpush3.bf16.msra.mxu1 %v990_v27  ;;  %875 = vmatprep.subr.bf16.mxu0 %v991_v28 }
  0x1e   :  { %897 = vmatprep.subr.bf16.mxu1 %v992_v29 }
  0x20   :  { %876 = vmatpush3.bf16.msra.mxu0 %v993_v30 }
  0x21   :  { %898 = vmatpush3.bf16.msra.mxu1 %v994_v31  ;;  %905 = vmatprep.subr.bf16.mxu0 %v995_v40 }
  0x22   :  { %927 = vmatprep.subr.bf16.mxu1 %v996_v41 }
  0x23   :  { %584 = vmatmul.mubr.bf16.vlgmr.msra.gmra.mxu0 %v30_v37 }
  0x24   :  { %624 = vmatmul.mubr.bf16.vlgmr.msra.gmra.mxu1 %v32_v39  ;;  %906 = vmatpush3.bf16.msra.mxu0 %v997_v42 }
  0x25   :  { %928 = vmatpush3.bf16.msra.mxu1 %v998_v43  ;;  %907 = vmatprep.subr.bf16.mxu0 %v999_v44 }
  0x26   :  { %929 = vmatprep.subr.bf16.mxu1 %v1000_v45  ;;  %663 = vmatprep.mubr.bf16.mxu0 %v35_v10 }
  0x27   :  { %703 = vmatprep.mubr.bf16.mxu1 %v37_v11 }
  0x28   :  { %908 = vmatpush3.bf16.msra.mxu0 %v1001_v46 }
  0x29   :  { %930 = vmatpush3.bf16.msra.mxu1 %v1002_v47  ;;  %909 = vmatprep.subr.bf16.mxu0 %v1003_v48 }
  0x2a   :  { %931 = vmatprep.subr.bf16.mxu1 %v1004_v49 }
  0x2c   :  { %910 = vmatpush3.bf16.msra.mxu0 %v1005_v50 }
  0x2d   :  { %932 = vmatpush3.bf16.msra.mxu1 %v1006_v51  ;;  %911 = vmatprep.subr.bf16.mxu0 %v1007_v52 }
  0x2e   :  { %933 = vmatprep.subr.bf16.mxu1 %v1008_v53 }
  0x30   :  { %912 = vmatpush3.bf16.msra.mxu0 %v1009_v54 }
  0x31   :  { %934 = vmatpush3.bf16.msra.mxu1 %v1010_v55  ;;  %913 = vmatprep.subr.bf16.mxu0 %v1011_v56 }
  0x32   :  { %935 = vmatprep.subr.bf16.mxu1 %v1012_v57 }
  0x34   :  { %914 = vmatpush3.bf16.msra.mxu0 %v1013_v58 }
  0x35   :  { %936 = vmatpush3.bf16.msra.mxu1 %v1014_v59  ;;  %915 = vmatprep.subr.bf16.mxu0 %v1015_v60 }
  0x36   :  { %937 = vmatprep.subr.bf16.mxu1 %v1016_v61 }
  0x38   :  { %916 = vmatpush3.bf16.msra.mxu0 %v1017_v62 }
  0x39   :  { %938 = vmatpush3.bf16.msra.mxu1 %v1018_v63  ;;  %917 = vmatprep.subr.bf16.mxu0 %v1019_v0 }
  0x3a   :  { %939 = vmatprep.subr.bf16.mxu1 %v1020_v1 }
  0x3c   :  { %918 = vmatpush3.bf16.msra.mxu0 %v1021_v2 }
  0x3d   :  { %940 = vmatpush3.bf16.msra.mxu1 %v1022_v3  ;;  %919 = vmatprep.subr.bf16.mxu0 %v1023_v4 }
  0x3e   :  { %941 = vmatprep.subr.bf16.mxu1 %v1024_v5 }
  0x40   :  { %920 = vmatpush3.bf16.msra.mxu0 %v1025_v6 }
  0x41   :  { %942 = vmatpush3.bf16.msra.mxu1 %v1026_v7 }
  0x42   :  { %8 = vsyncpa [#allocation4], 0  ;;  %vm20_vm0 = vcmask 261120   ;;  %v1051_v16 = vmov 0.0   ;;  %v1027_v17 = vld [vmem:[%s1304_s2 + $0x8] sm:$0xff]   ;;  %vm1052_vm1 = vmmov 0  }
  0x43   :  { %664 = vmatmul.mubr.bf16.vlgmr.msra.gmra.mxu0 %v34_v14  ;;  %21 = vst.msk [vmem:[#allocation2] sm:$0xff] %vm20_vm0, %v1051_v16  ;;  %952 = vmatprep.subr.bf16.mxu0 %v1051_v16  ;;  %v1028_v18 = vld [vmem:[%s1304_s2] sm:$0xff]   ;;  %s1053_s2 = smov [#allocation3]  }
  0x44   :  { %704 = vmatmul.mubr.bf16.vlgmr.msra.gmra.mxu1 %v36_v15  ;;  %956 = vmatprep.mubr.msk.bf16.mxu0 %vm1052_vm1, %v1051_v16  ;;  %s786_s23 = sshll.u32 %s1053_s2, 4  ;;  %s787_s23 = int_to_ptr.vmem [resolvable:$true] %s786_s23 }
  0x45   :  { %953 = vmatpush3.bf16.msra.mxu0 %v1027_v17  ;;  %s1029_s24 = scalar_lea.vmem %s787_s23, 128  ;;  %p1034_p1 = scmp.lt.s32.totalorder %s787_s23, %s787_s23 }
  0x46   :  { %954 = vmatprep.subr.bf16.mxu0 %v1051_v16  ;;  %p1030_p0 = scmp.ne.s32.totalorder %s787_s23, %s1029_s24  ;;  %p1035_p2 = scmp.lt.s32.totalorder %s1029_s24, %s1029_s24 }
  0x48   :  { %p1036_p3 = por %p1035_p2, %p1034_p1 }
  0x49   :  { %955 = vmatpush3.bf16.msra.mxu0 %v1028_v18 }
  0x4a   :  { %v38_v40 = vld [vmem:[#allocation2] sm:$0xff]  ;;  %p1037_p4 = pnand %p1036_p3, %p1030_p0 }
  0xe3   :  { %v877_v19 = vpop.f32.mrf.mxu0 }
  0xe4   :  { %v899_v20 = vpop.f32.mrf.mxu1 }
  0xe5   :  { %v878_v21 = vpop.f32.mrf.mxu0 }
  0xe6   :  { %v900_v22 = vpop.f32.mrf.mxu1  ;;  %v879_v27 = vadd.f32 %v878_v21, %v877_v19 }
  0xe7   :  { %v880_v23 = vpop.f32.mrf.mxu0  ;;  %v901_v28 = vadd.f32 %v900_v22, %v899_v20 }
  0xe8   :  { %v902_v24 = vpop.f32.mrf.mxu1 }
  0xe9   :  { %v881_v25 = vpop.f32.mrf.mxu0  ;;  %v626_v32 = vadd.f32 %v901_v28, %v879_v27 }
  0xea   :  { %v903_v26 = vpop.f32.mrf.mxu1 }
 0x103   :  { %v921_v29 = vpop.f32.mrf.mxu0 }
 0x104   :  { %v943_v30 = vpop.f32.mrf.mxu1 }
 0x105   :  { %v922_v31 = vpop.f32.mrf.mxu0 }
 0x106   :  { %v923_v33 = vadd.f32 %v922_v31, %v921_v29  ;;  %v944_v34 = vpop.f32.mrf.mxu1 }
 0x107   :  { %v924_v35 = vpop.f32.mrf.mxu0  ;;  %v945_v37 = vadd.f32 %v944_v34, %v943_v30 }
 0x108   :  { %v666_v36 = vadd.f32 %v923_v33, %v626_v32  ;;  %v946_v38 = vpop.f32.mrf.mxu1 }
 0x109   :  { %v925_v39 = vpop.f32.mrf.mxu0 }
 0x10a   :  { %v706_v41 = vadd.f32 %v945_v37, %v666_v36  ;;  %v947_v42 = vpop.f32.mrf.mxu1 }
 0x10c   :  { %v711_v43 = vadd.f32 %v706_v41, %v38_v40 }
 0x10e   :  { %713 = vst.msk [vmem:[#allocation2] sm:$0xff] %vm20_vm0, %v711_v43 }
 0x115   :  { %v717_v44 = vld [vmem:[#allocation2] sm:$0xff] }
 0x116   :  { %v718_v45 = vmax.f32 %v717_v44, 0.0 }
 0x118   :  { %v719_v46 = vpack.c.bf16 %v718_v45, %v718_v45 }
 0x11a   :  { %957 = vmatmul.mubr.msk.bf16.vlgmr.msra.gmra.mxu0 %vm20_vm0, %v719_v46 }
 0x1da   :  { %v773_v47 = vpop.f32.mrf.mxu0 }
 0x1db   :  { %779 = vst [vmem:[#allocation3] sm:$0xff] %v773_v47 }
 0x1dc   :  { %v958_v48 = vpop.f32.mrf.mxu0 }
 0x1dd   :  { %1040 = shalt.err (!%p1037_p4)
}
 0x1de   :  { %789 = dma.vmem_to_hbm [thread:$0]  %s787_s23, 128, %s1305_s3, [#allocation4]   ;;  %v776_v49 = vpop.f32.mrf.mxu0 }
 0x1e0   :  { %v959_v50 = vpop.f32.mrf.mxu0 }
 0x1e1   :  { %1049 = dma.done.wait [#allocation4], 128  }
 0x1e2   :  { %1050 = vsyncadd [#allocation4], 4294967168 }
 0x1e3   :  { %793 = vsyncpa [#allocation4], 1 }

</bundles_post_ra>
